<compile_context>
chip_gen: v6e
topology: v6e:2x2x1
jax: 0.10.0
libtpu: 0.0.40
codegen_flags: <defaults>
</compile_context>

<pallas_src>
import functools

import jax
import jax.numpy as jnp
from jax import lax
from jax.experimental import pallas as pl
from jax.experimental.pallas import tpu as pltpu


def _custom_loss_kernel(batch, dim, rows_padded,
                        idx_ref, ocr_ref, pred_ref, out_ref):
    # idx_ref  : (B, 1)  int32  flat row indices (precomputed in the wrapper)
    # ocr_ref  : (Rp, D) f32    flattened table, rows padded to a multiple of 8
    # pred_ref : (B, D)  f32    predictions
    # out_ref  : (1, 1)  f32    SMEM scalar output

    # Exact VPU gather: iota along the (padded) row axis compared against the
    # flat index, select matching table rows, reduce over the row axis.
    # No MXU pass -> no bf16 rounding; a padded / out-of-range index selects
    # nothing (zero row) instead of reading out of bounds.
    row_ids = lax.broadcasted_iota(jnp.int32, (batch, rows_padded, dim), 1)
    idx = idx_ref[...].reshape(batch, 1, 1)                       # (B, 1, 1)
    sel = jnp.where(row_ids == idx, ocr_ref[...][None, :, :], 0.0)  # (B, Rp, D)
    gathered = jnp.sum(sel, axis=1)                               # (B, D)

    # Single |diff| pass on the VPU, one cross-lane reduce, one scalar store.
    diff = jnp.abs(gathered - pred_ref[...])
    # L1Loss(reduction='mean') divides by the total element count B * D.
    out_ref[0, 0] = jnp.sum(diff) / jnp.float32(batch * dim)


def custom_loss(ocr_matrix, true_left_label, true_right_label, predicted_label):
    num_left, num_right, dim = ocr_matrix.shape
    batch = predicted_label.shape[0]
    rows = num_left * num_right
    rows_padded = ((rows + 7) // 8) * 8          # sublane-aligned table

    ocr_flat = ocr_matrix.reshape(rows, dim).astype(jnp.float32)
    if rows_padded != rows:
        ocr_flat = jnp.pad(ocr_flat, ((0, rows_padded - rows), (0, 0)))

    # Fold the label arithmetic into the wrapper: one (B, 1) int32 input.
    flat_idx = (true_left_label.astype(jnp.int32) * num_right
                + true_right_label.astype(jnp.int32)).reshape(batch, 1)
    pred_f32 = predicted_label.astype(jnp.float32)

    kernel = functools.partial(_custom_loss_kernel, batch, dim, rows_padded)

    # Advisory cost hint: selects/compares/adds over the (B, Rp, D) gather,
    # plus the tiny input/output traffic.
    cost = pl.CostEstimate(
        flops=2 * batch * rows_padded * dim,
        transcendentals=0,
        bytes_accessed=4 * (rows_padded * dim + 2 * batch * dim + batch),
    )

    # Scoped-VMEM guard sized from the actual arrays plus the (B, Rp, D)
    # select intermediate, with generous headroom.
    # TODO(synk): for production-sized tables (L*R in the thousands) or large
    # batch, switch to a PrefetchScalarGridSpec row gather (pl.Element(1)
    # blocks indexed by the prefetched flat_idx) with a B-parallel grid so the
    # full table never has to co-reside in v7x's 64 MiB VMEM.
    vmem_bytes = 4 * (rows_padded * dim + 2 * batch * dim
                      + batch * rows_padded * dim)
    vmem_limit = min(max(4 * vmem_bytes, 16 << 20), 100 << 20)

    out = pl.pallas_call(
        kernel,
        out_shape=jax.ShapeDtypeStruct((1, 1), jnp.float32),
        # grid=() (single invocation): full arrays resident in VMEM, no
        # pipelining / double-buffering for this fixed-overhead kernel.
        in_specs=[
            pl.BlockSpec(memory_space=pltpu.MemorySpace.VMEM),  # flat_idx (B, 1)
            pl.BlockSpec(memory_space=pltpu.MemorySpace.VMEM),  # ocr      (Rp, D)
            pl.BlockSpec(memory_space=pltpu.MemorySpace.VMEM),  # pred     (B, D)
        ],
        out_specs=pl.BlockSpec(memory_space=pltpu.MemorySpace.SMEM),
        compiler_params=pltpu.CompilerParams(vmem_limit_bytes=vmem_limit),
        cost_estimate=cost,
    )(flat_idx, ocr_flat, pred_f32)
    return out[0, 0]


if __name__ == "__main__":
    key = jax.random.PRNGKey(0)
    k1, k2, k3, k4 = jax.random.split(key, 4)

    num_left, num_right, dim, batch = 6, 5, 128, 8

    # Deterministic synthetic "parameters" / inputs (no checkpoint loading).
    ocr_matrix = jax.random.normal(k1, (num_left, num_right, dim), dtype=jnp.float32)
    predicted = jax.random.normal(k2, (batch, dim), dtype=jnp.float32)
    left = jax.random.randint(k3, (batch,), 0, num_left, dtype=jnp.int32)
    right = jax.random.randint(k4, (batch,), 0, num_right, dtype=jnp.int32)

    loss = custom_loss(ocr_matrix, left, right, predicted)
    loss = jax.block_until_ready(loss)

    # Pure-JAX reference of the PyTorch forward pass.
    true_label = ocr_matrix[left, right]                    # (B, D) gather
    ref = jnp.mean(jnp.abs(true_label - predicted))         # L1Loss(mean)
    assert jnp.allclose(loss, ref, rtol=1e-5, atol=1e-5), (float(loss), float(ref))

    print("KERNEL_OK")
</pallas_src>

<mosaic_0001>
module attributes {stable_mosaic.version = 11 : i64} {
  func.func @_custom_loss_kernel(%arg0: memref<8x1xi32, #tpu.memory_space<vmem>>, %arg1: memref<32x128xf32, #tpu.memory_space<vmem>>, %arg2: memref<8x128xf32, #tpu.memory_space<vmem>>, %arg3: memref<1x1xf32, #tpu.memory_space<smem>>) attributes {dimension_semantics = [], scalar_prefetch = 0 : i64, scratch_operands = 0 : i64, tpu.core_type = #tpu.core_type<tc>} {
    %0 = tpu.iota {dimensions = array<i32: 1>} : vector<8x32x128xi32>
    %c0 = arith.constant 0 : index
    %c0_0 = arith.constant 0 : index
    %1 = vector.load %arg0[%c0, %c0_0] : memref<8x1xi32, #tpu.memory_space<vmem>>, vector<8x1xi32>
    %2 = vector.shape_cast %1 : vector<8x1xi32> to vector<8x1x1xi32>
    %3 = vector.broadcast %2 : vector<8x1x1xi32> to vector<8x32x128xi32>
    %4 = arith.cmpi eq, %0, %3 : vector<8x32x128xi32>
    %c0_1 = arith.constant 0 : index
    %c0_2 = arith.constant 0 : index
    %5 = vector.load %arg1[%c0_1, %c0_2] : memref<32x128xf32, #tpu.memory_space<vmem>>, vector<32x128xf32>
    %6 = vector.shape_cast %5 : vector<32x128xf32> to vector<1x32x128xf32>
    %cst = arith.constant 0.000000e+00 : f32
    %7 = vector.shape_cast %6 : vector<1x32x128xf32> to vector<1x32x128xf32>
    %8 = vector.broadcast %7 : vector<1x32x128xf32> to vector<8x32x128xf32>
    %9 = vector.broadcast %cst : f32 to vector<8x32x128xf32>
    %10 = arith.select %4, %8, %9 : vector<8x32x128xi1>, vector<8x32x128xf32>
    %cst_3 = arith.constant dense<0.000000e+00> : vector<8x128xf32>
    %11 = vector.multi_reduction <add>, %10, %cst_3 [1] : vector<8x32x128xf32> to vector<8x128xf32>
    %c0_4 = arith.constant 0 : index
    %c0_5 = arith.constant 0 : index
    %12 = vector.load %arg2[%c0_4, %c0_5] : memref<8x128xf32, #tpu.memory_space<vmem>>, vector<8x128xf32>
    %13 = arith.subf %11, %12 : vector<8x128xf32>
    %14 = math.absf %13 : vector<8x128xf32>
    %15 = vector.shape_cast %14 : vector<8x128xf32> to vector<1x8x128xf32>
    %cst_6 = arith.constant dense<0.000000e+00> : vector<1xf32>
    %16 = vector.multi_reduction <add>, %15, %cst_6 [1, 2] : vector<1x8x128xf32> to vector<1xf32>
    %17 = vector.shape_cast %16 : vector<1xf32> to vector<1x1x1xf32>
    %18 = vector.extract %17[0, 0, 0] : f32 from vector<1x1x1xf32>
    %cst_7 = arith.constant 1.024000e+03 : f32
    %19 = arith.divf %18, %cst_7 : f32
    %c0_8 = arith.constant 0 : index
    %c0_9 = arith.constant 0 : index
    %20 = memref.load %arg3[%c0_8, %c0_9] : memref<1x1xf32, #tpu.memory_space<smem>>
    memref.store %19, %arg3[%c0_8, %c0_9] : memref<1x1xf32, #tpu.memory_space<smem>>
    return
  }
}

</mosaic_0001>

<bundles_post_ra>
// kernel: tpu_custom_call.1
= control target key start
LH: loop header
LB: loop body
LE: loop exit
PB: predicated region body
PF: predicated region fallthrough
CT: control target
= control target key end

     0   :  { %8 = vsyncpa [#allocation3], 0  ;;  %s547_s0 = inlined_call_operand.vmem [shape: s32[8,1], index: 0, kind: input, shape index: {}]   ;;  %s548_s1 = inlined_call_operand.hbm [shape: f32[32,128], index: 1, kind: input, shape index: {}]   ;;  %s549_s2 = inlined_call_operand.vmem [shape: f32[8,128], index: 2, kind: input, shape index: {}]   ;;  %s550_s3 = inlined_call_operand.hbm [shape: f32[1,1], index: 3, kind: output, shape index: {}]  }
   0x1   :  { %9 = vsyncpa [#allocation4], 0  ;;  %s414_s12 = smov [#allocation2]  }
   0x2   :  { %s17_s13 = sshll.u32 %s414_s12, 4  ;;  %s18_s13 = int_to_ptr.vmem [resolvable:$true] %s17_s13 }
   0x3   :  { %s390_s14 = scalar_lea.vmem %s18_s13, 512  ;;  %p395_p1 = scmp.lt.s32.totalorder %s18_s13, %s18_s13 }
   0x4   :  { %p391_p0 = scmp.ne.s32.totalorder %s18_s13, %s390_s14  ;;  %p396_p2 = scmp.lt.s32.totalorder %s390_s14, %s390_s14 }
   0x6   :  { %p397_p3 = por %p396_p2, %p395_p1 }
   0x8   :  { %p398_p4 = pnand %p397_p3, %p391_p0 }
   0xa   :  { %401 = shalt.err (!%p398_p4)
}
   0xb   :  { %s415_s15 = smov 128   ;;  %s416_s16 = smov 8  }
   0xc   :  { %23 = dma.hbm_to_vmem [thread:$0]  %s548_s1, 512, %s18_s13, [#allocation3], %s415_s15, %s415_s15, %s416_s16  }
   0xd   :  { %410 = dma.done.wait [#allocation3], 512  }
   0xe   :  { %411 = vsyncadd [#allocation3], 4294966784  ;;  %v29_v0 = vlaneseq  ;;  %v417_v1 = vmov 0   ;;  %v418_v2 = vmov 1966171168   ;;  %v34_v7 = vld [vmem:[%s547_s0] sm:$0xff] }
   0xf   :  { %379 = vset.pattern.permute.xlu1 %v417_v1  ;;  %v37_v3 = vunpack.c.l.s4 %v418_v2  ;;  %380 = vset.pattern.permute.xlu0 %v417_v1  ;;  %v35_v10 = vcombine.high %v34_v7, %v34_v7  ;;  %v459_v33 = vld [vmem:[#allocation2] sm:$0xff]  ;;  %v461_v34 = vld [vmem:[#allocation2 + $0x8] sm:$0xff]  ;;  %v463_v35 = vld [vmem:[#allocation2 + $0x10] sm:$0xff]  ;;  %s419_s22 = smov [#allocation5]  }
  0x10   :  { %v443_v4 = vshrl.u32 %v29_v0, 7  ;;  %v468_v37 = vld [vmem:[#allocation2 + $0x18] sm:$0xff] }
  0x11   :  { %v38_v5 = vunpack.c.0.s8 %v37_v3 }
  0x12   :  { %v86_v9 = vsub.s32 0, %v443_v4  ;;  %v451_v30 = vadd.s32 8, %v443_v4  ;;  %v454_v31 = vadd.s32 16, %v443_v4  ;;  %v457_v32 = vadd.s32 24, %v443_v4 }
  0x13   :  { %v41_v6 = vsub.s32 %v38_v5, %v443_v4 }
  0x15   :  { %v42_v8 = vrot.slane %v34_v7, %v41_v6  ;;  %v49_v12 = vrot.slane %v35_v10, %v41_v6 }
  0x17   :  { %v58_v11 = vrot.slane %v42_v8, %v41_v6  ;;  %v50_v13 = vcombine.high %v42_v8, %v42_v8  ;;  %v51_v17 = vcombine.high %v49_v12, %v49_v12  ;;  %v65_v23 = vrot.slane %v49_v12, %v41_v6 }
  0x19   :  { %v87_v14 = vrot.slane %v58_v11, %v86_v9  ;;  %v80_v15 = vcombine.high %v58_v11, %v58_v11  ;;  %v72_v16 = vrot.slane %v50_v13, %v41_v6  ;;  %v79_v20 = vrot.slane %v51_v17, %v41_v6 }
  0x1a   :  { %v103_v26 = vrot.slane %v65_v23, %v86_v9  ;;  %v81_v27 = vcombine.high %v65_v23, %v65_v23 }
  0x1b   :  { %117 = vperm.xlu1 %379, %v87_v14   ;;  %v91_v18 = vrot.slane %v72_v16, %v86_v9  ;;  %v82_v19 = vcombine.high %v72_v16, %v72_v16  ;;  %v95_v22 = vrot.slane %v80_v15, %v86_v9  ;;  %v107_v24 = vrot.slane %v79_v20, %v86_v9 }
  0x1c   :  { %v83_v25 = vcombine.high %v79_v20, %v79_v20  ;;  %v111_v29 = vrot.slane %v81_v27, %v86_v9 }
  0x1d   :  { %120 = vperm.xlu0 %380, %v91_v18   ;;  %v99_v21 = vrot.slane %v82_v19, %v86_v9 }
  0x1e   :  { %v115_v28 = vrot.slane %v83_v25, %v86_v9 }
  0x1f   :  { %126 = vperm.xlu1 %379, %v99_v21  }
  0x21   :  { %123 = vperm.xlu0 %380, %v95_v22  }
  0x23   :  { %132 = vperm.xlu1 %379, %v107_v24  }
  0x25   :  { %129 = vperm.xlu0 %380, %v103_v26  }
  0x27   :  { %138 = vperm.xlu1 %379, %v115_v28  }
  0x29   :  { %135 = vperm.xlu0 %380, %v111_v29  }
  0x96   :  { %v118_v36 = vpop.permute.xlu1 %117 }
  0x97   :  { %vm140_vm0 = vcmp.eq.s32.totalorder %v443_v4, %v118_v36  ;;  %vm141_vm1 = vcmp.eq.s32.totalorder %v451_v30, %v118_v36  ;;  %vm142_vm2 = vcmp.eq.s32.totalorder %v454_v31, %v118_v36  ;;  %vm143_vm3 = vcmp.eq.s32.totalorder %v457_v32, %v118_v36 }
  0x98   :  { %v176_v38 = vsel %vm140_vm0, %v459_v33, 0.0  ;;  %v177_v39 = vsel %vm141_vm1, %v461_v34, 0.0  ;;  %v178_v40 = vsel %vm142_vm2, %v463_v35, 0.0  ;;  %v121_v41 = vpop.permute.xlu0 %120  ;;  %v179_v46 = vsel %vm143_vm3, %v468_v37, 0.0 }
  0x99   :  { %v208_v42 = vadd.f32 %v177_v39, %v176_v38  ;;  %vm144_vm4 = vcmp.eq.s32.totalorder %v443_v4, %v121_v41  ;;  %vm145_vm5 = vcmp.eq.s32.totalorder %v451_v30, %v121_v41  ;;  %vm146_vm6 = vcmp.eq.s32.totalorder %v454_v31, %v121_v41 }
  0x9a   :  { %vm147_vm7 = vcmp.eq.s32.totalorder %v457_v32, %v121_v41  ;;  %v180_v43 = vsel %vm144_vm4, %v459_v33, 0.0  ;;  %v181_v44 = vsel %vm145_vm5, %v461_v34, 0.0  ;;  %v127_v45 = vpop.permute.xlu1 %126  ;;  %v182_v49 = vsel %vm146_vm6, %v463_v35, 0.0 }
  0x9b   :  { %v209_v47 = vadd.f32 %v208_v42, %v178_v40  ;;  %v217_v48 = vadd.f32 %v181_v44, %v180_v43  ;;  %vm152_vm8 = vcmp.eq.s32.totalorder %v443_v4, %v127_v45  ;;  %vm153_vm9 = vcmp.eq.s32.totalorder %v451_v30, %v127_v45  ;;  %v518_v40 = vld [vmem:[%s549_s2] sm:$0xff] }
  0x9c   :  { %vm154_vm10 = vcmp.eq.s32.totalorder %v454_v31, %v127_v45  ;;  %v188_v50 = vsel %vm152_vm8, %v459_v33, 0.0  ;;  %v124_v51 = vpop.permute.xlu0 %123  ;;  %v183_v52 = vsel %vm147_vm7, %v468_v37, 0.0  ;;  %v189_v54 = vsel %vm153_vm9, %v461_v34, 0.0 }
  0x9d   :  { %v218_v53 = vadd.f32 %v217_v48, %v182_v49  ;;  %vm155_vm11 = vcmp.eq.s32.totalorder %v457_v32, %v127_v45  ;;  %v235_v55 = vadd.f32 %v189_v54, %v188_v50  ;;  %vm148_vm12 = vcmp.eq.s32.totalorder %v443_v4, %v124_v51 }
  0x9e   :  { %vm149_vm13 = vcmp.eq.s32.totalorder %v451_v30, %v124_v51  ;;  %v210_v56 = vadd.f32 %v209_v47, %v179_v46  ;;  %v190_v58 = vsel %vm154_vm10, %v463_v35, 0.0  ;;  %vm150_vm14 = vcmp.eq.s32.totalorder %v454_v31, %v124_v51  ;;  %v133_v59 = vpop.permute.xlu1 %132 }
  0x9f   :  { %v219_v57 = vadd.f32 %v218_v53, %v183_v52  ;;  %v236_v60 = vadd.f32 %v235_v55, %v190_v58  ;;  %vm151_vm15 = vcmp.eq.s32.totalorder %v457_v32, %v124_v51  ;;  %v184_v61 = vsel %vm148_vm12, %v459_v33, 0.0 }
  0xa0   :  { %v185_v62 = vsel %vm149_vm13, %v461_v34, 0.0  ;;  %v191_v0 = vsel %vm155_vm11, %v468_v37, 0.0  ;;  %v186_v3 = vsel %vm150_vm14, %v463_v35, 0.0  ;;  %vm160_vm0 = vcmp.eq.s32.totalorder %v443_v4, %v133_v59  ;;  %v130_v8 = vpop.permute.xlu0 %129 }
  0xa1   :  { %v220_v63 = vrot.slane %v219_v57, 4  ;;  %v226_v1 = vadd.f32 %v185_v62, %v184_v61  ;;  %v237_v2 = vadd.f32 %v236_v60, %v191_v0  ;;  %vm161_vm1 = vcmp.eq.s32.totalorder %v451_v30, %v133_v59 }
  0xa2   :  { %v211_v5 = vrot.slane %v210_v56, 4  ;;  %v187_v6 = vsel %vm151_vm15, %v468_v37, 0.0  ;;  %vm162_vm2 = vcmp.eq.s32.totalorder %v454_v31, %v133_v59  ;;  %v196_v10 = vsel %vm160_vm0, %v459_v33, 0.0  ;;  %v139_v25 = vpop.permute.xlu1 %138 }
  0xa3   :  { %v227_v7 = vadd.f32 %v226_v1, %v186_v3  ;;  %v221_v9 = vadd.f32 %v220_v63, %v219_v57  ;;  %v197_v11 = vsel %vm161_vm1, %v461_v34, 0.0  ;;  %v238_v12 = vrot.slane %v237_v2, 4 }
  0xa4   :  { %vm163_vm3 = vcmp.eq.s32.totalorder %v457_v32, %v133_v59  ;;  %v253_v14 = vadd.f32 %v197_v11, %v196_v10  ;;  %vm156_vm4 = vcmp.eq.s32.totalorder %v443_v4, %v130_v8  ;;  %vm157_vm5 = vcmp.eq.s32.totalorder %v451_v30, %v130_v8  ;;  %v136_v48 = vpop.permute.xlu0 %135 }
  0xa5   :  { %v228_v13 = vadd.f32 %v227_v7, %v187_v6  ;;  %v212_v15 = vadd.f32 %v211_v5, %v210_v56  ;;  %v198_v17 = vsel %vm162_vm2, %v463_v35, 0.0  ;;  %v222_v18 = vrot.slane %v221_v9, 2 }
  0xa6   :  { %v199_v19 = vsel %vm163_vm3, %v468_v37, 0.0  ;;  %v254_v20 = vadd.f32 %v253_v14, %v198_v17  ;;  %v192_v21 = vsel %vm156_vm4, %v459_v33, 0.0  ;;  %v239_v22 = vadd.f32 %v238_v12, %v237_v2 }
  0xa7   :  { %v229_v16 = vrot.slane %v228_v13, 4  ;;  %vm158_vm6 = vcmp.eq.s32.totalorder %v454_v31, %v130_v8  ;;  %v193_v24 = vsel %vm157_vm5, %v461_v34, 0.0  ;;  %v213_v27 = vrot.slane %v212_v15, 2 }
  0xa8   :  { %v255_v26 = vadd.f32 %v254_v20, %v199_v19  ;;  %vm159_vm7 = vcmp.eq.s32.totalorder %v457_v32, %v130_v8  ;;  %v244_v29 = vadd.f32 %v193_v24, %v192_v21  ;;  %v223_v36 = vadd.f32 %v222_v18, %v221_v9 }
  0xa9   :  { %v230_v23 = vadd.f32 %v229_v16, %v228_v13  ;;  %v194_v39 = vsel %vm158_vm6, %v463_v35, 0.0  ;;  %vm168_vm8 = vcmp.eq.s32.totalorder %v443_v4, %v139_v25  ;;  %v240_v41 = vrot.slane %v239_v22, 2 }
  0xaa   :  { %v256_v38 = vrot.slane %v255_v26, 4  ;;  %v245_v42 = vadd.f32 %v244_v29, %v194_v39  ;;  %vm169_vm9 = vcmp.eq.s32.totalorder %v451_v30, %v139_v25  ;;  %v195_v44 = vsel %vm159_vm7, %v468_v37, 0.0 }
  0xab   :  { %v231_v28 = vrot.slane %v230_v23, 2  ;;  %vm170_vm10 = vcmp.eq.s32.totalorder %v454_v31, %v139_v25  ;;  %v204_v47 = vsel %vm168_vm8, %v459_v33, 0.0  ;;  %v214_v49 = vadd.f32 %v213_v27, %v212_v15 }
  0xac   :  { %v257_v45 = vadd.f32 %v256_v38, %v255_v26  ;;  %v246_v46 = vadd.f32 %v245_v42, %v195_v44  ;;  %v282_v50 = vrot.slane %v518_v40, 1  ;;  %v224_v51 = vrot.slane %v223_v36, 1 }
  0xad   :  { %v232_v43 = vadd.f32 %v231_v28, %v230_v23  ;;  %v205_v52 = vsel %vm169_vm9, %v461_v34, 0.0  ;;  %v241_v53 = vadd.f32 %v240_v41, %v239_v22  ;;  %vm171_vm11 = vcmp.eq.s32.totalorder %v457_v32, %v139_v25 }
  0xae   :  { %v247_v54 = vrot.slane %v246_v46, 4  ;;  %v271_v55 = vadd.f32 %v205_v52, %v204_v47  ;;  %v206_v57 = vsel %vm170_vm10, %v463_v35, 0.0  ;;  %vm164_vm12 = vcmp.eq.s32.totalorder %v443_v4, %v136_v48 }
  0xaf   :  { %v233_v56 = vrot.slane %v232_v43, 1  ;;  %vm165_vm13 = vcmp.eq.s32.totalorder %v451_v30, %v136_v48  ;;  %v283_v58 = vrot.slane %v518_v40, 2  ;;  %v258_v59 = vrot.slane %v257_v45, 2 }
  0xb0   :  { %v248_v60 = vadd.f32 %v247_v54, %v246_v46  ;;  %v272_v61 = vadd.f32 %v271_v55, %v206_v57  ;;  %v207_v62 = vsel %vm171_vm11, %v468_v37, 0.0  ;;  %vm166_vm14 = vcmp.eq.s32.totalorder %v454_v31, %v136_v48 }
  0xb1   :  { %v200_v63 = vsel %vm164_vm12, %v459_v33, 0.0  ;;  %v201_v0 = vsel %vm165_vm13, %v461_v34, 0.0  ;;  %v215_v1 = vrot.slane %v214_v49, 1  ;;  %v225_v2 = vadd.f32 %v224_v51, %v223_v36 }
  0xb2   :  { %v249_v3 = vrot.slane %v248_v60, 2  ;;  %v273_v5 = vadd.f32 %v272_v61, %v207_v62  ;;  %v242_v4 = vrot.slane %v241_v53, 1  ;;  %v234_v6 = vadd.f32 %v233_v56, %v232_v43 }
  0xb3   :  { %vm167_vm15 = vcmp.eq.s32.totalorder %v457_v32, %v136_v48  ;;  %v262_v30 = vadd.f32 %v201_v0, %v200_v63  ;;  %v259_v7 = vadd.f32 %v258_v59, %v257_v45  ;;  %v202_v10 = vsel %vm166_vm14, %v463_v35, 0.0 }
  0xb4   :  { %v250_v8 = vadd.f32 %v249_v3, %v248_v60  ;;  %v274_v9 = vrot.slane %v273_v5, 4  ;;  %v284_v31 = vrot.slane %v518_v40, 3  ;;  %v298_v33 = vsub.f32 %v225_v2, %v282_v50 }
  0xb5   :  { %v263_v11 = vadd.f32 %v262_v30, %v202_v10  ;;  %v203_v13 = vsel %vm167_vm15, %v468_v37, 0.0  ;;  %v216_v14 = vadd.f32 %v215_v1, %v214_v49  ;;  %v299_v15 = vsub.f32 %v234_v6, %v283_v58 }
  0xb6   :  { %v251_v12 = vrot.slane %v250_v8, 1  ;;  %v275_v34 = vadd.f32 %v274_v9, %v273_v5  ;;  %v285_v17 = vrot.slane %v518_v40, 4  ;;  %v243_v32 = vadd.f32 %v242_v4, %v241_v53 }
  0xb7   :  { %v264_v16 = vadd.f32 %v263_v11, %v203_v13  ;;  %v260_v18 = vrot.slane %v259_v7, 1  ;;  %v306_v22 = vand.u32 2147483647, %v298_v33  ;;  %v307_v23 = vand.u32 2147483647, %v299_v15 }
  0xb8   :  { %v252_v19 = vadd.f32 %v251_v12, %v250_v8  ;;  %v276_v20 = vrot.slane %v275_v34, 2  ;;  %v286_v25 = vrot.slane %v518_v40, 5  ;;  %v297_v27 = vsub.f32 %v216_v14, %v518_v40 }
  0xb9   :  { %v265_v21 = vrot.slane %v264_v16, 4  ;;  %v261_v37 = vadd.f32 %v260_v18, %v259_v7  ;;  %v300_v29 = vsub.f32 %v243_v32, %v284_v31  ;;  %v321_v38 = vrot.slane %v306_v22, 7 }
  0xba   :  { %v277_v35 = vadd.f32 %v276_v20, %v275_v34  ;;  %v301_v26 = vsub.f32 %v252_v19, %v285_v17  ;;  %v288_v41 = vrot.slane %v518_v40, 7  ;;  %vm322_vm0 = vcmask 1041409  }
  0xbb   :  { %v266_v24 = vadd.f32 %v265_v21, %v264_v16  ;;  %v324_v44 = vrot.slane %v307_v23, 6  ;;  %v305_v45 = vand.u32 2147483647, %v297_v27  ;;  %v302_v46 = vsub.f32 %v261_v37, %v286_v25 }
  0xbc   :  { %v278_v28 = vrot.slane %v277_v35, 1  ;;  %v309_v43 = vand.u32 2147483647, %v301_v26  ;;  %v308_v47 = vand.u32 2147483647, %v300_v29  ;;  %vm325_vm1 = vcmask 1042434  }
  0xbd   :  { %v267_v36 = vrot.slane %v266_v24, 2  ;;  %v287_v49 = vrot.slane %v518_v40, 6  ;;  %v323_v51 = vsel %vm322_vm0, %v321_v38, %v305_v45  ;;  %vm328_vm2 = vcmask 1043459  }
  0xbe   :  { %v279_v39 = vadd.f32 %v278_v28, %v277_v35  ;;  %v326_v53 = vsel %vm325_vm1, %v324_v44, %v323_v51  ;;  %v330_v54 = vrot.slane %v309_v43, 4  ;;  %v310_v55 = vand.u32 2147483647, %v302_v46 }
  0xbf   :  { %v268_v42 = vadd.f32 %v267_v36, %v266_v24  ;;  %v327_v56 = vrot.slane %v308_v47, 5  ;;  %vm331_vm3 = vcmask 1044484   ;;  %vm334_vm4 = vcmask 1045509  }
  0xc0   :  { %v304_v50 = vsub.f32 %v279_v39, %v288_v41  ;;  %v333_v62 = vrot.slane %v310_v55, 3  ;;  %vm337_vm5 = vcmask 1046534   ;;  %vm340_vm6 = vcmask 1047559  }
  0xc1   :  { %v269_v48 = vrot.slane %v268_v42, 1  ;;  %v329_v59 = vsel %vm328_vm2, %v327_v56, %v326_v53 }
  0xc2   :  { %v312_v58 = vand.u32 2147483647, %v304_v50  ;;  %v332_v61 = vsel %vm331_vm3, %v330_v54, %v329_v59 }
  0xc3   :  { %v270_v52 = vadd.f32 %v269_v48, %v268_v42  ;;  %v335_v40 = vsel %vm334_vm4, %v333_v62, %v332_v61 }
  0xc4   :  { %v339_v0 = vrot.slane %v312_v58, 1 }
  0xc5   :  { %v303_v57 = vsub.f32 %v270_v52, %v287_v49 }
  0xc7   :  { %v311_v60 = vand.u32 2147483647, %v303_v57 }
  0xc9   :  { %v336_v63 = vrot.slane %v311_v60, 2 }
  0xcb   :  { %v338_v1 = vsel %vm337_vm5, %v336_v63, %v335_v40 }
  0xcc   :  { %v341_v2 = vsel %vm340_vm6, %v339_v0, %v338_v1 }
  0xcd   :  { %343 = vadd.xlane.f32.xlu0 %v341_v2 }
 0x156   :  { %v344_v3 = vpop.xlane.xlu0 %343 }
 0x157   :  { %v345_v5 = vrot.slane %v344_v3, 4 }
 0x159   :  { %v346_v4 = vadd.f32 %v345_v5, %v344_v3 }
 0x15b   :  { %v347_v6 = vrot.slane %v346_v4, 2 }
 0x15d   :  { %v348_v30 = vadd.f32 %v347_v6, %v346_v4 }
 0x15f   :  { %v349_v7 = vrot.slane %v348_v30, 1 }
 0x161   :  { %v350_v8 = vadd.f32 %v349_v7, %v348_v30 }
 0x163   :  { %371 = vpush %v350_v8 }
 0x194   :  { %s372_s2 = spop %371 }
 0x195   :  { %s354_s21 = smul.f32 0.0009765625, %s372_s2 }
 0x197   :  { %356 = sst [smem:[#allocation5]] %s354_s21 }
 0x198   :  { %364 = dma.smem_to_hbm %s419_s22, 16, %s550_s3, [#allocation4]  }
 0x199   :  { %412 = dma.done.wait [#allocation4], 16  }
 0x19a   :  { %413 = vsyncadd [#allocation4], 4294967280 }
 0x19b   :  { %368 = sfence }
 0x19c   :  { %369 = vsyncpa [#allocation3], 1 }
 0x19d   :  { %370 = vsyncpa [#allocation4], 1 }

</bundles_post_ra>
